<compile_context>
chip_gen: v7x
topology: tpu7x:2x2x1
jax: 0.10.0
libtpu: 0.0.40
codegen_flags: <defaults>
</compile_context>

<pallas_src>
import functools

import jax
import jax.numpy as jnp
from jax.experimental import pallas as pl
from jax.experimental.pallas import tpu as pltpu

_LANE = 128
_FUSED_VMEM_BUDGET = 40 * 2**20      # conservative vs. v7x's 64 MiB physical VMEM
_FUSED_WEIGHT_BUDGET = 28 * 2**20    # resident-weight cap before a tiled path is needed


def _round_up(x, m):
    return ((x + m - 1) // m) * m


def _fused_mlp_kernel(*refs, num_layers, compute_dtype):
    """Whole MLP for one batch tile; activations never leave VMEM/vregs between layers."""
    x_ref = refs[2 * num_layers]
    o_ref = refs[2 * num_layers + 1]
    h = x_ref[...]                                     # (bt, Din0_pad), compute_dtype
    # Statically unrolled: L is small here.
    # TODO(synk): for deep uniform-width MLPs (L >= ~8) switch to a stacked (L, D, D)
    #             weight layout + lax.fori_loop over layers to bound code size / vregs.
    for l in range(num_layers):
        w = refs[2 * l][...]                           # (Din_pad, Dout_pad), compute_dtype
        b = refs[2 * l + 1][...]                       # (1, Dout_pad), f32
        y = jnp.dot(h, w, preferred_element_type=jnp.float32)   # MXU, f32 accumulate
        y = y + b                                      # f32 epilogue
        if l < num_layers - 1:
            y = jnp.maximum(y, 0.0).astype(compute_dtype)        # ReLU, back to bf16/f32
        h = y                                          # last layer: identity, f32
    o_ref[...] = h.astype(o_ref.dtype)


def pack_mlp_params(params, *, use_bf16=True):
    """Pad + cast weights/biases ONCE, outside the per-call path.

    params: list of (W (in, out), b (out,)). Each layer is padded to its own
    128-multiples. Returns a flat tuple (w0, b0, w1, b1, ...).
    """
    cdtype = jnp.bfloat16 if use_bf16 else jnp.float32
    packed = []
    for w, b in params:
        din, dout = w.shape
        din_p, dout_p = _round_up(din, _LANE), _round_up(dout, _LANE)
        w_p = jnp.zeros((din_p, dout_p), cdtype).at[:din, :dout].set(w.astype(cdtype))
        b_p = jnp.zeros((1, dout_p), jnp.float32).at[0, :dout].set(b.astype(jnp.float32))
        packed.extend([w_p, b_p])
    return tuple(packed)


def _vmem_need(batch_tile, din0_pad, dout_last_pad, dmax_pad, w_bytes, b_bytes,
               x_item, out_item, weight_bufs):
    act_io = (2 * batch_tile * din0_pad * x_item          # double-buffered x tiles
              + 2 * batch_tile * dout_last_pad * out_item)  # double-buffered out tiles
    work = 2 * batch_tile * dmax_pad * 4                  # in-flight f32 activations
    return weight_bufs * w_bytes + 2 * b_bytes + act_io + work


def mlp_forward(x, packed, *, dout_last, out_dtype=jnp.float32, single_buffer_weights=True):
    """x: (B, din0); packed: output of pack_mlp_params. Returns (B, dout_last) out_dtype."""
    B, din0 = x.shape
    L = len(packed) // 2
    w_list, b_list = packed[0::2], packed[1::2]
    compute_dtype = jnp.dtype(w_list[0].dtype)
    x_item = compute_dtype.itemsize
    out_item = jnp.dtype(out_dtype).itemsize

    din0_pad = w_list[0].shape[0]
    dout_last_pad = w_list[-1].shape[1]
    dmax_pad = max([din0_pad] + [w.shape[1] for w in w_list])
    assert din0 <= din0_pad and dout_last <= dout_last_pad

    w_bytes = sum(w.size * w.dtype.itemsize for w in w_list)
    b_bytes = sum(b.size * b.dtype.itemsize for b in b_list)
    weight_bufs = 1 if single_buffer_weights else 2

    # ---- batch tiling ---------------------------------------------------------
    sublane = 16 if compute_dtype.itemsize == 2 else 8     # full vreg sublane packing
    B_pad = _round_up(max(B, sublane), sublane)
    if B_pad < 256:
        batch_tile = B_pad          # single grid step: any split is pure overhead here
    else:
        batch_tile = 128
        if B_pad >= 512 and _vmem_need(256, din0_pad, dout_last_pad, dmax_pad, w_bytes,
                                       b_bytes, x_item, out_item,
                                       weight_bufs) <= _FUSED_VMEM_BUDGET:
            batch_tile = 256        # fill the 2x256x256 MXU on v6e/v7x
        B_pad = _round_up(B_pad, batch_tile)
    n_tiles = B_pad // batch_tile

    # ---- VMEM accounting (v7x-aware) ------------------------------------------
    assert weight_bufs * w_bytes <= _FUSED_WEIGHT_BUDGET, (
        "fused-MLP resident weights too large for VMEM; need the K/N-tiled path")
    # TODO(synk): K/N-tiled per-layer matmul path (resident f32 accumulator, pl.when
    #             init/finalize, reduction axis last + "arbitrary") for layers whose
    #             weights do not fit VMEM; fp8-weight variant for v7x.
    vmem_need = _vmem_need(batch_tile, din0_pad, dout_last_pad, dmax_pad, w_bytes,
                           b_bytes, x_item, out_item, weight_bufs)
    vmem_limit = int(min(48 * 2**20, max(int(1.5 * vmem_need), 16 * 2**20)))

    # ---- pad the input batch once, already in compute dtype --------------------
    x_pad = jnp.zeros((B_pad, din0_pad), compute_dtype).at[:B, :din0].set(
        x.astype(compute_dtype))

    # ---- specs ------------------------------------------------------------------
    wb_kwargs = {}
    if single_buffer_weights:
        # Grid-invariant blocks: one resident copy instead of double-buffering.
        wb_kwargs["pipeline_mode"] = pl.Buffered(1)
    in_specs = []
    for l in range(L):
        din_p, dout_p = w_list[l].shape
        in_specs.append(pl.BlockSpec((din_p, dout_p), lambda i: (0, 0), **wb_kwargs))
        in_specs.append(pl.BlockSpec((1, dout_p), lambda i: (0, 0), **wb_kwargs))
    in_specs.append(pl.BlockSpec((batch_tile, din0_pad), lambda i: (i, 0)))
    out_spec = pl.BlockSpec((batch_tile, dout_last_pad), lambda i: (i, 0))

    flops = 2 * B_pad * sum(w.shape[0] * w.shape[1] for w in w_list)
    bytes_accessed = int(B_pad * din0_pad * x_item + B_pad * dout_last_pad * out_item
                         + w_bytes + b_bytes)

    kernel = functools.partial(_fused_mlp_kernel, num_layers=L,
                               compute_dtype=compute_dtype)
    out = pl.pallas_call(
        kernel,
        out_shape=jax.ShapeDtypeStruct((B_pad, dout_last_pad), out_dtype),
        grid_spec=pltpu.PrefetchScalarGridSpec(
            num_scalar_prefetch=0,
            grid=(n_tiles,),
            in_specs=in_specs,
            out_specs=out_spec,
        ),
        compiler_params=pltpu.CompilerParams(
            dimension_semantics=("parallel",),
            vmem_limit_bytes=vmem_limit,
        ),
        cost_estimate=pl.CostEstimate(flops=flops, transcendentals=0,
                                      bytes_accessed=bytes_accessed),
    )(*packed, x_pad)

    return out[:B, :dout_last]


def init_mlp_params(sizes, key):
    """Deterministic params matching nn.Linear shapes; W stored as (in, out)."""
    params = []
    for j in range(len(sizes) - 1):
        fan_in, fan_out = sizes[j], sizes[j + 1]
        key, kw, kb = jax.random.split(key, 3)
        bound = 1.0 / jnp.sqrt(fan_in)
        w = jax.random.uniform(kw, (fan_in, fan_out), jnp.float32, -bound, bound)
        b = jax.random.uniform(kb, (fan_out,), jnp.float32, -bound, bound)
        params.append((w, b))
    return params


def mlp_reference(x, params):
    """Plain-JAX f32 reference for correctness check."""
    n = len(params)
    h = x
    for j, (w, b) in enumerate(params):
        h = h @ w + b
        if j < n - 1:
            h = jnp.maximum(h, 0.0)
    return h


if __name__ == "__main__":
    # MLP(sizes=[32, 64, 64, 16], activation=nn.ReLU, output_activation=nn.Identity)
    sizes = [32, 64, 64, 16]
    batch = 8

    key = jax.random.PRNGKey(0)
    key, kx = jax.random.split(key)
    x = jax.random.normal(kx, (batch, sizes[0]), jnp.float32)
    params = init_mlp_params(sizes, key)
    ref = mlp_reference(x, params)

    fwd = jax.jit(mlp_forward,
                  static_argnames=("dout_last", "out_dtype", "single_buffer_weights"))

    # Pack (pad + cast) weights ONCE, outside the per-call path.
    packed_bf16 = pack_mlp_params(params, use_bf16=True)
    packed_f32 = pack_mlp_params(params, use_bf16=False)

    def run(packed, sbw):
        return jax.block_until_ready(
            fwd(x, packed, dout_last=sizes[-1], single_buffer_weights=sbw))

    # bf16 matmul operands / f32 accumulation (fast path on v6e/v7x, v5e-safe epilogue).
    try:
        single_buf = True
        out_bf16 = run(packed_bf16, single_buf)
    except Exception:
        # This jax build rejects pl.Buffered(1) on pallas_call BlockSpecs; fall back to
        # default (double-buffered) weight blocks -- correctness is unaffected.
        single_buf = False
        out_bf16 = run(packed_bf16, single_buf)

    assert out_bf16.shape == (batch, sizes[-1])
    assert jnp.allclose(out_bf16, ref, atol=5e-2, rtol=5e-2)

    # Full f32 path matches the reference tightly (exact PyTorch semantics).
    out_f32 = run(packed_f32, single_buf)
    assert jnp.allclose(out_f32, ref, atol=1e-5, rtol=1e-5)

    print("KERNEL_OK")
</pallas_src>

<mosaic_0001>
module attributes {stable_mosaic.version = 11 : i64} {
  func.func @_fused_mlp_kernel(%arg0: i32, %arg1: memref<128x128xbf16, #tpu.memory_space<vmem>>, %arg2: memref<1x128xf32, #tpu.memory_space<vmem>>, %arg3: memref<128x128xbf16, #tpu.memory_space<vmem>>, %arg4: memref<1x128xf32, #tpu.memory_space<vmem>>, %arg5: memref<128x128xbf16, #tpu.memory_space<vmem>>, %arg6: memref<1x128xf32, #tpu.memory_space<vmem>>, %arg7: memref<16x128xbf16, #tpu.memory_space<vmem>>, %arg8: memref<16x128xf32, #tpu.memory_space<vmem>>) attributes {dimension_semantics = [#tpu.dimension_semantics<parallel>], iteration_bounds = array<i64: 1>, scalar_prefetch = 0 : i64, scratch_operands = 0 : i64, tpu.core_type = #tpu.core_type<tc>, window_params = [{pipeline_mode = #tpu.pipeline_mode<synchronous>, transform_indices = @transform_0, window_bounds = array<i64: 128, 128>}, {pipeline_mode = #tpu.pipeline_mode<synchronous>, transform_indices = @transform_1, window_bounds = array<i64: 1, 128>}, {pipeline_mode = #tpu.pipeline_mode<synchronous>, transform_indices = @transform_2, window_bounds = array<i64: 128, 128>}, {pipeline_mode = #tpu.pipeline_mode<synchronous>, transform_indices = @transform_3, window_bounds = array<i64: 1, 128>}, {pipeline_mode = #tpu.pipeline_mode<synchronous>, transform_indices = @transform_4, window_bounds = array<i64: 128, 128>}, {pipeline_mode = #tpu.pipeline_mode<synchronous>, transform_indices = @transform_5, window_bounds = array<i64: 1, 128>}, {transform_indices = @transform_6, window_bounds = array<i64: 16, 128>}, {transform_indices = @transform_7, window_bounds = array<i64: 16, 128>}]} {
    %c0 = arith.constant 0 : index
    %c0_0 = arith.constant 0 : index
    %0 = vector.load %arg7[%c0, %c0_0] : memref<16x128xbf16, #tpu.memory_space<vmem>>, vector<16x128xbf16>
    %c0_1 = arith.constant 0 : index
    %c0_2 = arith.constant 0 : index
    %1 = vector.load %arg1[%c0_1, %c0_2] : memref<128x128xbf16, #tpu.memory_space<vmem>>, vector<128x128xbf16>
    %c0_3 = arith.constant 0 : index
    %c0_4 = arith.constant 0 : index
    %2 = vector.load %arg2[%c0_3, %c0_4] : memref<1x128xf32, #tpu.memory_space<vmem>>, vector<1x128xf32>
    %cst = arith.constant dense<0.000000e+00> : vector<16x128xf32>
    %3 = tpu.matmul %0, %1, %cst {dimension_numbers = #tpu.dot_dimension_numbers<[1], [0], [0], [1], [0, 0, 1, 1], [], []>} : vector<16x128xbf16>, vector<128x128xbf16>, vector<16x128xf32> -> vector<16x128xf32>
    %4 = vector.broadcast %2 : vector<1x128xf32> to vector<16x128xf32>
    %5 = arith.addf %3, %4 : vector<16x128xf32>
    %cst_5 = arith.constant 0.000000e+00 : f32
    %6 = vector.broadcast %cst_5 : f32 to vector<16x128xf32>
    %7 = arith.maximumf %5, %6 : vector<16x128xf32>
    %8 = arith.truncf %7 : vector<16x128xf32> to vector<16x128xbf16>
    %c0_6 = arith.constant 0 : index
    %c0_7 = arith.constant 0 : index
    %9 = vector.load %arg3[%c0_6, %c0_7] : memref<128x128xbf16, #tpu.memory_space<vmem>>, vector<128x128xbf16>
    %c0_8 = arith.constant 0 : index
    %c0_9 = arith.constant 0 : index
    %10 = vector.load %arg4[%c0_8, %c0_9] : memref<1x128xf32, #tpu.memory_space<vmem>>, vector<1x128xf32>
    %cst_10 = arith.constant dense<0.000000e+00> : vector<16x128xf32>
    %11 = tpu.matmul %8, %9, %cst_10 {dimension_numbers = #tpu.dot_dimension_numbers<[1], [0], [0], [1], [0, 0, 1, 1], [], []>} : vector<16x128xbf16>, vector<128x128xbf16>, vector<16x128xf32> -> vector<16x128xf32>
    %12 = vector.broadcast %10 : vector<1x128xf32> to vector<16x128xf32>
    %13 = arith.addf %11, %12 : vector<16x128xf32>
    %cst_11 = arith.constant 0.000000e+00 : f32
    %14 = vector.broadcast %cst_11 : f32 to vector<16x128xf32>
    %15 = arith.maximumf %13, %14 : vector<16x128xf32>
    %16 = arith.truncf %15 : vector<16x128xf32> to vector<16x128xbf16>
    %c0_12 = arith.constant 0 : index
    %c0_13 = arith.constant 0 : index
    %17 = vector.load %arg5[%c0_12, %c0_13] : memref<128x128xbf16, #tpu.memory_space<vmem>>, vector<128x128xbf16>
    %c0_14 = arith.constant 0 : index
    %c0_15 = arith.constant 0 : index
    %18 = vector.load %arg6[%c0_14, %c0_15] : memref<1x128xf32, #tpu.memory_space<vmem>>, vector<1x128xf32>
    %cst_16 = arith.constant dense<0.000000e+00> : vector<16x128xf32>
    %19 = tpu.matmul %16, %17, %cst_16 {dimension_numbers = #tpu.dot_dimension_numbers<[1], [0], [0], [1], [0, 0, 1, 1], [], []>} : vector<16x128xbf16>, vector<128x128xbf16>, vector<16x128xf32> -> vector<16x128xf32>
    %20 = vector.broadcast %18 : vector<1x128xf32> to vector<16x128xf32>
    %21 = arith.addf %19, %20 : vector<16x128xf32>
    %c0_17 = arith.constant 0 : index
    %c0_18 = arith.constant 0 : index
    %22 = vector.load %arg8[%c0_17, %c0_18] : memref<16x128xf32, #tpu.memory_space<vmem>>, vector<16x128xf32>
    tpu.vector_store %arg8[%c0_17, %c0_18], %21 {strides = array<i32>} : memref<16x128xf32, #tpu.memory_space<vmem>>, vector<16x128xf32>,
    return
  }
  func.func @transform_0(%arg0: i32) -> (i32, i32) {
    %c0_i32 = arith.constant 0 : i32
    %c0_i32_0 = arith.constant 0 : i32
    %c0_i32_1 = arith.constant 0 : i32
    return %c0_i32, %c0_i32_0 : i32, i32
  }
  func.func @transform_1(%arg0: i32) -> (i32, i32) {
    %c0_i32 = arith.constant 0 : i32
    %c0_i32_0 = arith.constant 0 : i32
    %c0_i32_1 = arith.constant 0 : i32
    return %c0_i32, %c0_i32_0 : i32, i32
  }
  func.func @transform_2(%arg0: i32) -> (i32, i32) {
    %c0_i32 = arith.constant 0 : i32
    %c0_i32_0 = arith.constant 0 : i32
    %c0_i32_1 = arith.constant 0 : i32
    return %c0_i32, %c0_i32_0 : i32, i32
  }
  func.func @transform_3(%arg0: i32) -> (i32, i32) {
    %c0_i32 = arith.constant 0 : i32
    %c0_i32_0 = arith.constant 0 : i32
    %c0_i32_1 = arith.constant 0 : i32
    return %c0_i32, %c0_i32_0 : i32, i32
  }
  func.func @transform_4(%arg0: i32) -> (i32, i32) {
    %c0_i32 = arith.constant 0 : i32
    %c0_i32_0 = arith.constant 0 : i32
    %c0_i32_1 = arith.constant 0 : i32
    return %c0_i32, %c0_i32_0 : i32, i32
  }
  func.func @transform_5(%arg0: i32) -> (i32, i32) {
    %c0_i32 = arith.constant 0 : i32
    %c0_i32_0 = arith.constant 0 : i32
    %c0_i32_1 = arith.constant 0 : i32
    return %c0_i32, %c0_i32_0 : i32, i32
  }
  func.func @transform_6(%arg0: i32) -> (i32, i32) {
    %c0_i32 = arith.constant 0 : i32
    %c0_i32_0 = arith.constant 0 : i32
    return %arg0, %c0_i32 : i32, i32
  }
  func.func @transform_7(%arg0: i32) -> (i32, i32) {
    %c0_i32 = arith.constant 0 : i32
    %c0_i32_0 = arith.constant 0 : i32
    return %arg0, %c0_i32 : i32, i32
  }
}

module attributes {stable_mosaic.version = 11 : i64} {
  func.func @_fused_mlp_kernel(%arg0: i32, %arg1: memref<128x128xbf16, #tpu.memory_space<vmem>>, %arg2: memref<1x128xf32, #tpu.memory_space<vmem>>, %arg3: memref<128x128xbf16, #tpu.memory_space<vmem>>, %arg4: memref<1x128xf32, #tpu.memory_space<vmem>>, %arg5: memref<128x128xbf16, #tpu.memory_space<vmem>>, %arg6: memref<1x128xf32, #tpu.memory_space<vmem>>, %arg7: memref<16x128xbf16, #tpu.memory_space<vmem>>, %arg8: memref<16x128xf32, #tpu.memory_space<vmem>>) attributes {dimension_semantics = [#tpu.dimension_semantics<parallel>], iteration_bounds = array<i64: 1>, scalar_prefetch = 0 : i64, scratch_operands = 0 : i64, tpu.core_type = #tpu.core_type<tc>, window_params = [{pipeline_mode = #tpu.pipeline_mode<synchronous>, transform_indices = @transform_0, window_bounds = array<i64: 128, 128>}, {pipeline_mode = #tpu.pipeline_mode<synchronous>, transform_indices = @transform_1, window_bounds = array<i64: 1, 128>}, {pipeline_mode = #tpu.pipeline_mode<synchronous>, transform_indices = @transform_2, window_bounds = array<i64: 128, 128>}, {pipeline_mode = #tpu.pipeline_mode<synchronous>, transform_indices = @transform_3, window_bounds = array<i64: 1, 128>}, {pipeline_mode = #tpu.pipeline_mode<synchronous>, transform_indices = @transform_4, window_bounds = array<i64: 128, 128>}, {pipeline_mode = #tpu.pipeline_mode<synchronous>, transform_indices = @transform_5, window_bounds = array<i64: 1, 128>}, {transform_indices = @transform_6, window_bounds = array<i64: 16, 128>}, {transform_indices = @transform_7, window_bounds = array<i64: 16, 128>}]} {
    %c0 = arith.constant 0 : index
    %c0_0 = arith.constant 0 : index
    %0 = vector.load %arg7[%c0, %c0_0] : memref<16x128xbf16, #tpu.memory_space<vmem>>, vector<16x128xbf16>
    %c0_1 = arith.constant 0 : index
    %c0_2 = arith.constant 0 : index
    %1 = vector.load %arg1[%c0_1, %c0_2] : memref<128x128xbf16, #tpu.memory_space<vmem>>, vector<128x128xbf16>
    %c0_3 = arith.constant 0 : index
    %c0_4 = arith.constant 0 : index
    %2 = vector.load %arg2[%c0_3, %c0_4] : memref<1x128xf32, #tpu.memory_space<vmem>>, vector<1x128xf32>
    %cst = arith.constant dense<0.000000e+00> : vector<16x128xf32>
    %3 = tpu.matmul %0, %1, %cst {dimension_numbers = #tpu.dot_dimension_numbers<[1], [0], [0], [1], [0, 0, 1, 1], [], []>} : vector<16x128xbf16>, vector<128x128xbf16>, vector<16x128xf32> -> vector<16x128xf32>
    %4 = vector.broadcast %2 : vector<1x128xf32> to vector<16x128xf32>
    %5 = arith.addf %3, %4 : vector<16x128xf32>
    %cst_5 = arith.constant 0.000000e+00 : f32
    %6 = vector.broadcast %cst_5 : f32 to vector<16x128xf32>
    %7 = arith.maximumf %5, %6 : vector<16x128xf32>
    %8 = arith.truncf %7 : vector<16x128xf32> to vector<16x128xbf16>
    %c0_6 = arith.constant 0 : index
    %c0_7 = arith.constant 0 : index
    %9 = vector.load %arg3[%c0_6, %c0_7] : memref<128x128xbf16, #tpu.memory_space<vmem>>, vector<128x128xbf16>
    %c0_8 = arith.constant 0 : index
    %c0_9 = arith.constant 0 : index
    %10 = vector.load %arg4[%c0_8, %c0_9] : memref<1x128xf32, #tpu.memory_space<vmem>>, vector<1x128xf32>
    %cst_10 = arith.constant dense<0.000000e+00> : vector<16x128xf32>
    %11 = tpu.matmul %8, %9, %cst_10 {dimension_numbers = #tpu.dot_dimension_numbers<[1], [0], [0], [1], [0, 0, 1, 1], [], []>} : vector<16x128xbf16>, vector<128x128xbf16>, vector<16x128xf32> -> vector<16x128xf32>
    %12 = vector.broadcast %10 : vector<1x128xf32> to vector<16x128xf32>
    %13 = arith.addf %11, %12 : vector<16x128xf32>
    %cst_11 = arith.constant 0.000000e+00 : f32
    %14 = vector.broadcast %cst_11 : f32 to vector<16x128xf32>
    %15 = arith.maximumf %13, %14 : vector<16x128xf32>
    %16 = arith.truncf %15 : vector<16x128xf32> to vector<16x128xbf16>
    %c0_12 = arith.constant 0 : index
    %c0_13 = arith.constant 0 : index
    %17 = vector.load %arg5[%c0_12, %c0_13] : memref<128x128xbf16, #tpu.memory_space<vmem>>, vector<128x128xbf16>
    %c0_14 = arith.constant 0 : index
    %c0_15 = arith.constant 0 : index
    %18 = vector.load %arg6[%c0_14, %c0_15] : memref<1x128xf32, #tpu.memory_space<vmem>>, vector<1x128xf32>
    %cst_16 = arith.constant dense<0.000000e+00> : vector<16x128xf32>
    %19 = tpu.matmul %16, %17, %cst_16 {dimension_numbers = #tpu.dot_dimension_numbers<[1], [0], [0], [1], [0, 0, 1, 1], [], []>} : vector<16x128xbf16>, vector<128x128xbf16>, vector<16x128xf32> -> vector<16x128xf32>
    %20 = vector.broadcast %18 : vector<1x128xf32> to vector<16x128xf32>
    %21 = arith.addf %19, %20 : vector<16x128xf32>
    %c0_17 = arith.constant 0 : index
    %c0_18 = arith.constant 0 : index
    %22 = vector.load %arg8[%c0_17, %c0_18] : memref<16x128xf32, #tpu.memory_space<vmem>>, vector<16x128xf32>
    tpu.vector_store %arg8[%c0_17, %c0_18], %21 {strides = array<i32>} : memref<16x128xf32, #tpu.memory_space<vmem>>, vector<16x128xf32>,
    return
  }
  func.func @transform_0(%arg0: i32) -> (i32, i32) {
    %c0_i32 = arith.constant 0 : i32
    %c0_i32_0 = arith.constant 0 : i32
    %c0_i32_1 = arith.constant 0 : i32
    return %c0_i32, %c0_i32_0 : i32, i32
  }
  func.func @transform_1(%arg0: i32) -> (i32, i32) {
    %c0_i32 = arith.constant 0 : i32
    %c0_i32_0 = arith.constant 0 : i32
    %c0_i32_1 = arith.constant 0 : i32
    return %c0_i32, %c0_i32_0 : i32, i32
  }
  func.func @transform_2(%arg0: i32) -> (i32, i32) {
    %c0_i32 = arith.constant 0 : i32
    %c0_i32_0 = arith.constant 0 : i32
    %c0_i32_1 = arith.constant 0 : i32
    return %c0_i32, %c0_i32_0 : i32, i32
  }
  func.func @transform_3(%arg0: i32) -> (i32, i32) {
    %c0_i32 = arith.constant 0 : i32
    %c0_i32_0 = arith.constant 0 : i32
    %c0_i32_1 = arith.constant 0 : i32
    return %c0_i32, %c0_i32_0 : i32, i32
  }
  func.func @transform_4(%arg0: i32) -> (i32, i32) {
    %c0_i32 = arith.constant 0 : i32
    %c0_i32_0 = arith.constant 0 : i32
    %c0_i32_1 = arith.constant 0 : i32
    return %c0_i32, %c0_i32_0 : i32, i32
  }
  func.func @transform_5(%arg0: i32) -> (i32, i32) {
    %c0_i32 = arith.constant 0 : i32
    %c0_i32_0 = arith.constant 0 : i32
    %c0_i32_1 = arith.constant 0 : i32
    return %c0_i32, %c0_i32_0 : i32, i32
  }
  func.func @transform_6(%arg0: i32) -> (i32, i32) {
    %c0_i32 = arith.constant 0 : i32
    %c0_i32_0 = arith.constant 0 : i32
    return %arg0, %c0_i32 : i32, i32
  }
  func.func @transform_7(%arg0: i32) -> (i32, i32) {
    %c0_i32 = arith.constant 0 : i32
    %c0_i32_0 = arith.constant 0 : i32
    return %arg0, %c0_i32 : i32, i32
  }
}

</mosaic_0001>

<bundles_post_ra>
// kernel: mlp_forward.1
= control target key start
LH: loop header
LB: loop body
LE: loop exit
PB: predicated region body
PF: predicated region fallthrough
CT: control target
= control target key end

     0   :  { %12 = vsyncpa [#allocation3], 0  ;;  %s790_s0 = inlined_call_operand.hbm [shape: bf16[128,128], index: 0, kind: input, shape index: {}]   ;;  %s791_s1 = inlined_call_operand.vmem [shape: f32[1,128], index: 1, kind: input, shape index: {}]   ;;  %s792_s2 = inlined_call_operand.hbm [shape: bf16[128,128], index: 2, kind: input, shape index: {}]   ;;  %s793_s3 = inlined_call_operand.vmem [shape: f32[1,128], index: 3, kind: input, shape index: {}]   ;;  %s794_s4 = inlined_call_operand.hbm [shape: bf16[128,128], index: 4, kind: input, shape index: {}]   ;;  %s795_s5 = inlined_call_operand.vmem [shape: f32[1,128], index: 5, kind: input, shape index: {}]   ;;  %s796_s6 = inlined_call_operand.vmem [shape: bf16[16,128], index: 6, kind: input, shape index: {}]   ;;  %s797_s7 = inlined_call_operand.vmem [shape: f32[16,128], index: 7, kind: output, shape index: {}]  }
   0x1   :  { %13 = vsyncpa [#allocation5], 0  ;;  %s643_s24 = smov [#allocation4]   ;;  %s644_s26 = smov [#allocation2]  }
   0x2   :  { %s33_s25 = sshll.u32 %s643_s24, 4  ;;  %s19_s27 = sshll.u32 %s644_s26, 4  ;;  %s34_s25 = int_to_ptr.vmem [resolvable:$true] %s33_s25  ;;  %s690_s27 = int_to_ptr.vmem [resolvable:$true] %s19_s27 }
   0x3   :  { %s573_s30 = scalar_lea.hbm %s792_s2, 1024 }
   0x4   :  { %p574_p0 = scmp.ne.s32.totalorder %s792_s2, %s573_s30  ;;  %p577_p1 = scmp.lt.u32.totalorder %s573_s30, %s792_s2 }
   0x6   :  { %p579_p2 = pnand %p577_p1, %p574_p0 }
   0x8   :  { %582 = shalt.err (!%p579_p2)
}
   0x9   :  { %s583_s12 = scalar_lea.vmem %s34_s25, 1024  ;;  %p588_p4 = scmp.lt.s32.totalorder %s34_s25, %s34_s25 }
   0xa   :  { %p584_p3 = scmp.ne.s32.totalorder %s34_s25, %s583_s12  ;;  %p589_p5 = scmp.lt.s32.totalorder %s583_s12, %s583_s12 }
   0xc   :  { %p590_p6 = por %p589_p5, %p588_p4 }
   0xe   :  { %p591_p7 = pnand %p590_p6, %p584_p3 }
  0x10   :  { %594 = shalt.err (!%p591_p7)
}
  0x11   :  { %s645_s13 = smov 64   ;;  %s646_s14 = smov 4  }
  0x12   :  { %39 = dma.hbm_to_vmem [thread:$0]  %s792_s2, 1024, %s34_s25, [#allocation5], %s645_s13, %s645_s13, %s646_s14  }
  0x13   :  { %s595_s19 = scalar_lea.hbm %s790_s0, 1024 }
  0x14   :  { %p596_p8 = scmp.ne.s32.totalorder %s790_s0, %s595_s19  ;;  %p599_p9 = scmp.lt.u32.totalorder %s595_s19, %s790_s0 }
  0x16   :  { %p601_p10 = pnand %p599_p9, %p596_p8 }
  0x18   :  { %604 = shalt.err (!%p601_p10)
}
  0x19   :  { %s605_s24 = scalar_lea.vmem %s690_s27, 1024  ;;  %p610_p12 = scmp.lt.s32.totalorder %s690_s27, %s690_s27 }
  0x1a   :  { %p606_p11 = scmp.ne.s32.totalorder %s690_s27, %s605_s24  ;;  %p611_p13 = scmp.lt.s32.totalorder %s605_s24, %s605_s24 }
  0x1c   :  { %p612_p0 = por %p611_p13, %p610_p12 }
  0x1e   :  { %p613_p1 = pnand %p612_p0, %p606_p11 }
  0x20   :  { %616 = shalt.err (!%p613_p1)
}
  0x21   :  { %25 = dma.hbm_to_vmem [thread:$0]  %s790_s0, 1024, %s690_s27, [#allocation3], %s645_s13, %s645_s13, %s646_s14  }
  0x22   :  { %s647_s26 = smov [#allocation6]   ;;  %s617_s8 = scalar_lea.hbm %s794_s4, 1024 }
  0x23   :  { %s47_s28 = sshll.u32 %s647_s26, 4  ;;  %p618_p2 = scmp.ne.s32.totalorder %s794_s4, %s617_s8  ;;  %s48_s28 = int_to_ptr.vmem [resolvable:$true] %s47_s28 }
  0x24   :  { %p621_p3 = scmp.lt.u32.totalorder %s617_s8, %s794_s4 }
  0x26   :  { %p623_p4 = pnand %p621_p3, %p618_p2 }
  0x28   :  { %626 = shalt.err (!%p623_p4)
}
  0x29   :  { %s627_s15 = scalar_lea.vmem %s48_s28, 1024  ;;  %p632_p6 = scmp.lt.s32.totalorder %s48_s28, %s48_s28 }
  0x2a   :  { %p628_p5 = scmp.ne.s32.totalorder %s48_s28, %s627_s15  ;;  %p633_p7 = scmp.lt.s32.totalorder %s627_s15, %s627_s15 }
  0x2c   :  { %p634_p8 = por %p633_p7, %p632_p6 }
  0x2e   :  { %p635_p9 = pnand %p634_p8, %p628_p5 }
  0x30   :  { %638 = shalt.err (!%p635_p9)
}
  0x31   :  { %53 = dma.hbm_to_vmem [thread:$0]  %s794_s4, 1024, %s48_s28, [#allocation5], %s645_s13, %s645_s13, %s646_s14  }
  0x32   :  { %639 = dma.done.wait [#allocation3], 1024  }
  0x33   :  { %640 = vsyncadd [#allocation3], 4294966272 }
  0x34   :  { %641 = dma.done.wait [#allocation5], 2048  }
  0x35   :  { %642 = vsyncadd [#allocation5], 4294965248  ;;  %v648_v0 = vmov 0.0   ;;  %vm649_vm0 = vmmov 0   ;;  %v548_v1 = vld [vmem:[#allocation2] sm:$0xff]   ;;  %v549_v2 = vld [vmem:[#allocation2 + $0x8] sm:$0xff]  }
  0x36   :  { %481 = vmatprep.subr.bf16.mxu0 %v648_v0  ;;  %497 = vmatprep.mubr.msk.bf16.mxu0 %vm649_vm0, %v648_v0  ;;  %v550_v3 = vld [vmem:[#allocation2 + $0x10] sm:$0xff]   ;;  %v557_v4 = vld [vmem:[#allocation4] sm:$0xff]   ;;  %v551_v5 = vld [vmem:[#allocation2 + $0x18] sm:$0xff]  }
  0x37   :  { %501 = vmatprep.subr.bf16.mxu1 %v648_v0  ;;  %517 = vmatprep.mubr.msk.bf16.mxu1 %vm649_vm0, %v648_v0  ;;  %v558_v6 = vld [vmem:[#allocation4 + $0x8] sm:$0xff]   ;;  %v552_v7 = vld [vmem:[#allocation2 + $0x20] sm:$0xff]   ;;  %v559_v8 = vld [vmem:[#allocation4 + $0x10] sm:$0xff]  }
  0x38   :  { %482 = vmatpush3.bf16.msra.mxu0 %v548_v1  ;;  %502 = vmatpush3.bf16.msra.mxu1 %v557_v4  ;;  %v553_v9 = vld [vmem:[#allocation2 + $0x28] sm:$0xff]   ;;  %v560_v10 = vld [vmem:[#allocation4 + $0x18] sm:$0xff]   ;;  %v554_v11 = vld [vmem:[#allocation2 + $0x30] sm:$0xff]  }
  0x39   :  { %483 = vmatprep.subr.bf16.mxu0 %v648_v0  ;;  %503 = vmatprep.subr.bf16.mxu1 %v648_v0  ;;  %v561_v12 = vld [vmem:[#allocation4 + $0x20] sm:$0xff]   ;;  %v555_v13 = vld [vmem:[#allocation2 + $0x38] sm:$0xff]   ;;  %v562_v14 = vld [vmem:[#allocation4 + $0x28] sm:$0xff]  }
  0x3a   :  { %v556_v15 = vld [vmem:[%s796_s6] sm:$0xff]   ;;  %v563_v16 = vld [vmem:[#allocation4 + $0x30] sm:$0xff]   ;;  %v564_v17 = vld [vmem:[#allocation4 + $0x38] sm:$0xff]  }
  0x3b   :  { %v565_v18 = vld [vmem:[#allocation6] sm:$0xff]   ;;  %v566_v19 = vld [vmem:[#allocation6 + $0x8] sm:$0xff]   ;;  %v567_v20 = vld [vmem:[#allocation6 + $0x10] sm:$0xff]  }
  0x3c   :  { %484 = vmatpush3.bf16.msra.mxu0 %v549_v2  ;;  %504 = vmatpush3.bf16.msra.mxu1 %v558_v6  ;;  %v568_v21 = vld [vmem:[#allocation6 + $0x18] sm:$0xff]   ;;  %v569_v22 = vld [vmem:[#allocation6 + $0x20] sm:$0xff]   ;;  %v570_v23 = vld [vmem:[#allocation6 + $0x28] sm:$0xff]  }
  0x3d   :  { %485 = vmatprep.subr.bf16.mxu0 %v648_v0  ;;  %505 = vmatprep.subr.bf16.mxu1 %v648_v0  ;;  %v426_v24 = vld [vmem:[%s791_s1] ss:$0 sm:$0xff]  ;;  %v571_v34 = vld [vmem:[#allocation6 + $0x30] sm:$0xff]   ;;  %v572_v35 = vld [vmem:[#allocation6 + $0x38] sm:$0xff]  }
  0x3e   :  { %v436_v36 = vld [vmem:[%s793_s3] ss:$0 sm:$0xff] }
  0x3f   :  { %v445_v46 = vld [vmem:[%s795_s5] ss:$0 sm:$0xff] }
  0x40   :  { %486 = vmatpush3.bf16.msra.mxu0 %v550_v3  ;;  %506 = vmatpush3.bf16.msra.mxu1 %v559_v8 }
  0x41   :  { %487 = vmatprep.subr.bf16.mxu0 %v648_v0  ;;  %507 = vmatprep.subr.bf16.mxu1 %v648_v0 }
  0x44   :  { %488 = vmatpush3.bf16.msra.mxu0 %v551_v5  ;;  %508 = vmatpush3.bf16.msra.mxu1 %v560_v10 }
  0x45   :  { %489 = vmatprep.subr.bf16.mxu0 %v648_v0  ;;  %509 = vmatprep.subr.bf16.mxu1 %v648_v0 }
  0x48   :  { %490 = vmatpush3.bf16.msra.mxu0 %v552_v7  ;;  %510 = vmatpush3.bf16.msra.mxu1 %v561_v12 }
  0x49   :  { %491 = vmatprep.subr.bf16.mxu0 %v648_v0  ;;  %511 = vmatprep.subr.bf16.mxu1 %v648_v0 }
  0x4c   :  { %492 = vmatpush3.bf16.msra.mxu0 %v553_v9  ;;  %512 = vmatpush3.bf16.msra.mxu1 %v562_v14 }
  0x4d   :  { %493 = vmatprep.subr.bf16.mxu0 %v648_v0  ;;  %513 = vmatprep.subr.bf16.mxu1 %v648_v0 }
  0x50   :  { %494 = vmatpush3.bf16.msra.mxu0 %v554_v11  ;;  %514 = vmatpush3.bf16.msra.mxu1 %v563_v16 }
  0x51   :  { %495 = vmatprep.subr.bf16.mxu0 %v648_v0  ;;  %515 = vmatprep.subr.bf16.mxu1 %v648_v0 }
  0x54   :  { %496 = vmatpush3.bf16.msra.mxu0 %v555_v13  ;;  %516 = vmatpush3.bf16.msra.mxu1 %v564_v17 }
  0x55   :  { %521 = vmatprep.subr.bf16.mxu0 %v648_v0 }
  0x57   :  { %498 = vmatmul.mubr.bf16.vlgmr.msra.gmra.mrb[0].mxu0 %v556_v15 }
  0x58   :  { %537 = vmatprep.mubr.msk.bf16.mxu0 %vm649_vm0, %v648_v0  ;;  %522 = vmatpush3.bf16.msra.mxu0 %v565_v18 }
  0x59   :  { %523 = vmatprep.subr.bf16.mxu0 %v648_v0 }
  0x5c   :  { %524 = vmatpush3.bf16.msra.mxu0 %v566_v19 }
  0x5d   :  { %525 = vmatprep.subr.bf16.mxu0 %v648_v0 }
  0x60   :  { %526 = vmatpush3.bf16.msra.mxu0 %v567_v20 }
  0x61   :  { %527 = vmatprep.subr.bf16.mxu0 %v648_v0 }
  0x64   :  { %528 = vmatpush3.bf16.msra.mxu0 %v568_v21 }
  0x65   :  { %529 = vmatprep.subr.bf16.mxu0 %v648_v0 }
  0x68   :  { %530 = vmatpush3.bf16.msra.mxu0 %v569_v22 }
  0x69   :  { %531 = vmatprep.subr.bf16.mxu0 %v648_v0 }
  0x6c   :  { %532 = vmatpush3.bf16.msra.mxu0 %v570_v23 }
  0x6d   :  { %533 = vmatprep.subr.bf16.mxu0 %v648_v0 }
  0x70   :  { %534 = vmatpush3.bf16.msra.mxu0 %v571_v34 }
  0x71   :  { %535 = vmatprep.subr.bf16.mxu0 %v648_v0 }
  0x74   :  { %536 = vmatpush3.bf16.msra.mxu0 %v572_v35 }
 0x12a   :  { %v181_v25 = vpop.f32.mrb[0].mxu0 }
 0x12b   :  { %v182_v26 = vadd.f32 %v426_v24, %v181_v25  ;;  %v499_v27 = vpop.f32.mrb[1].mxu0 }
 0x12c   :  { %v184_v28 = vpop.f32.mrb[2].mxu0 }
 0x12d   :  { %v185_v29 = vadd.f32 %v426_v24, %v184_v28  ;;  %v500_v30 = vpop.f32.mrb[3].mxu0  ;;  %v188_v31 = vmax.f32 %v182_v26, 0.0 }
 0x12f   :  { %v189_v32 = vmax.f32 %v185_v29, 0.0 }
 0x131   :  { %v190_v33 = vpack.c.bf16 %v189_v32, %v188_v31 }
 0x133   :  { %518 = vmatmul.mubr.bf16.vlgmr.msra.gmra.mrb[0].mxu1 %v190_v33 }
 0x206   :  { %v296_v37 = vpop.f32.mrb[0].mxu1 }
 0x207   :  { %v297_v38 = vadd.f32 %v436_v36, %v296_v37  ;;  %v519_v39 = vpop.f32.mrb[1].mxu1 }
 0x208   :  { %v299_v40 = vpop.f32.mrb[2].mxu1 }
 0x209   :  { %v300_v41 = vadd.f32 %v436_v36, %v299_v40  ;;  %v520_v42 = vpop.f32.mrb[3].mxu1  ;;  %v303_v43 = vmax.f32 %v297_v38, 0.0 }
 0x20b   :  { %v304_v44 = vmax.f32 %v300_v41, 0.0 }
 0x20d   :  { %v305_v45 = vpack.c.bf16 %v304_v44, %v303_v43 }
 0x20f   :  { %538 = vmatmul.mubr.bf16.vlgmr.msra.gmra.mrb[4].mxu0 %v305_v45 }
 0x2e2   :  { %v411_v47 = vpop.f32.mrb[4].mxu0 }
 0x2e3   :  { %v412_v48 = vadd.f32 %v445_v46, %v411_v47  ;;  %v539_v49 = vpop.f32.mrb[5].mxu0 }
 0x2e4   :  { %v414_v50 = vpop.f32.mrb[6].mxu0 }
 0x2e5   :  { %418 = vst [vmem:[%s797_s7] sm:$0xff] %v412_v48  ;;  %v415_v51 = vadd.f32 %v445_v46, %v414_v50  ;;  %v540_v52 = vpop.f32.mrb[7].mxu0 }
 0x2e7   :  { %419 = vst [vmem:[%s797_s7 + $0x8] sm:$0xff] %v415_v51 }
 0x2e8   :  { %424 = vsyncpa [#allocation3], 1 }
 0x2e9   :  { %425 = vsyncpa [#allocation5], 1 }

// kernel: mlp_forward.1
= control target key start
LH: loop header
LB: loop body
LE: loop exit
PB: predicated region body
PF: predicated region fallthrough
CT: control target
= control target key end

     0   :  { %12 = vsyncpa [#allocation3], 0  ;;  %s790_s0 = inlined_call_operand.hbm [shape: bf16[128,128], index: 0, kind: input, shape index: {}]   ;;  %s791_s1 = inlined_call_operand.vmem [shape: f32[1,128], index: 1, kind: input, shape index: {}]   ;;  %s792_s2 = inlined_call_operand.hbm [shape: bf16[128,128], index: 2, kind: input, shape index: {}]   ;;  %s793_s3 = inlined_call_operand.vmem [shape: f32[1,128], index: 3, kind: input, shape index: {}]   ;;  %s794_s4 = inlined_call_operand.hbm [shape: bf16[128,128], index: 4, kind: input, shape index: {}]   ;;  %s795_s5 = inlined_call_operand.vmem [shape: f32[1,128], index: 5, kind: input, shape index: {}]   ;;  %s796_s6 = inlined_call_operand.vmem [shape: bf16[16,128], index: 6, kind: input, shape index: {}]   ;;  %s797_s7 = inlined_call_operand.vmem [shape: f32[16,128], index: 7, kind: output, shape index: {}]  }
   0x1   :  { %13 = vsyncpa [#allocation5], 0  ;;  %s643_s24 = smov [#allocation4]   ;;  %s644_s26 = smov [#allocation2]  }
   0x2   :  { %s33_s25 = sshll.u32 %s643_s24, 4  ;;  %s19_s27 = sshll.u32 %s644_s26, 4  ;;  %s34_s25 = int_to_ptr.vmem [resolvable:$true] %s33_s25  ;;  %s690_s27 = int_to_ptr.vmem [resolvable:$true] %s19_s27 }
   0x3   :  { %s573_s30 = scalar_lea.hbm %s792_s2, 1024 }
   0x4   :  { %p574_p0 = scmp.ne.s32.totalorder %s792_s2, %s573_s30  ;;  %p577_p1 = scmp.lt.u32.totalorder %s573_s30, %s792_s2 }
   0x6   :  { %p579_p2 = pnand %p577_p1, %p574_p0 }
   0x8   :  { %582 = shalt.err (!%p579_p2)
}
   0x9   :  { %s583_s12 = scalar_lea.vmem %s34_s25, 1024  ;;  %p588_p4 = scmp.lt.s32.totalorder %s34_s25, %s34_s25 }
   0xa   :  { %p584_p3 = scmp.ne.s32.totalorder %s34_s25, %s583_s12  ;;  %p589_p5 = scmp.lt.s32.totalorder %s583_s12, %s583_s12 }
   0xc   :  { %p590_p6 = por %p589_p5, %p588_p4 }
   0xe   :  { %p591_p7 = pnand %p590_p6, %p584_p3 }
  0x10   :  { %594 = shalt.err (!%p591_p7)
}
  0x11   :  { %s645_s13 = smov 64   ;;  %s646_s14 = smov 4  }
  0x12   :  { %39 = dma.hbm_to_vmem [thread:$0]  %s792_s2, 1024, %s34_s25, [#allocation5], %s645_s13, %s645_s13, %s646_s14  }
  0x13   :  { %s595_s19 = scalar_lea.hbm %s790_s0, 1024 }
  0x14   :  { %p596_p8 = scmp.ne.s32.totalorder %s790_s0, %s595_s19  ;;  %p599_p9 = scmp.lt.u32.totalorder %s595_s19, %s790_s0 }
  0x16   :  { %p601_p10 = pnand %p599_p9, %p596_p8 }
  0x18   :  { %604 = shalt.err (!%p601_p10)
}
  0x19   :  { %s605_s24 = scalar_lea.vmem %s690_s27, 1024  ;;  %p610_p12 = scmp.lt.s32.totalorder %s690_s27, %s690_s27 }
  0x1a   :  { %p606_p11 = scmp.ne.s32.totalorder %s690_s27, %s605_s24  ;;  %p611_p13 = scmp.lt.s32.totalorder %s605_s24, %s605_s24 }
  0x1c   :  { %p612_p0 = por %p611_p13, %p610_p12 }
  0x1e   :  { %p613_p1 = pnand %p612_p0, %p606_p11 }
  0x20   :  { %616 = shalt.err (!%p613_p1)
}
  0x21   :  { %25 = dma.hbm_to_vmem [thread:$0]  %s790_s0, 1024, %s690_s27, [#allocation3], %s645_s13, %s645_s13, %s646_s14  }
  0x22   :  { %s647_s26 = smov [#allocation6]   ;;  %s617_s8 = scalar_lea.hbm %s794_s4, 1024 }
  0x23   :  { %s47_s28 = sshll.u32 %s647_s26, 4  ;;  %p618_p2 = scmp.ne.s32.totalorder %s794_s4, %s617_s8  ;;  %s48_s28 = int_to_ptr.vmem [resolvable:$true] %s47_s28 }
  0x24   :  { %p621_p3 = scmp.lt.u32.totalorder %s617_s8, %s794_s4 }
  0x26   :  { %p623_p4 = pnand %p621_p3, %p618_p2 }
  0x28   :  { %626 = shalt.err (!%p623_p4)
}
  0x29   :  { %s627_s15 = scalar_lea.vmem %s48_s28, 1024  ;;  %p632_p6 = scmp.lt.s32.totalorder %s48_s28, %s48_s28 }
  0x2a   :  { %p628_p5 = scmp.ne.s32.totalorder %s48_s28, %s627_s15  ;;  %p633_p7 = scmp.lt.s32.totalorder %s627_s15, %s627_s15 }
  0x2c   :  { %p634_p8 = por %p633_p7, %p632_p6 }
  0x2e   :  { %p635_p9 = pnand %p634_p8, %p628_p5 }
  0x30   :  { %638 = shalt.err (!%p635_p9)
}
  0x31   :  { %53 = dma.hbm_to_vmem [thread:$0]  %s794_s4, 1024, %s48_s28, [#allocation5], %s645_s13, %s645_s13, %s646_s14  }
  0x32   :  { %639 = dma.done.wait [#allocation3], 1024  }
  0x33   :  { %640 = vsyncadd [#allocation3], 4294966272 }
  0x34   :  { %641 = dma.done.wait [#allocation5], 2048  }
  0x35   :  { %642 = vsyncadd [#allocation5], 4294965248  ;;  %v648_v0 = vmov 0.0   ;;  %vm649_vm0 = vmmov 0   ;;  %v548_v1 = vld [vmem:[#allocation2] sm:$0xff]   ;;  %v549_v2 = vld [vmem:[#allocation2 + $0x8] sm:$0xff]  }
  0x36   :  { %481 = vmatprep.subr.bf16.mxu0 %v648_v0  ;;  %497 = vmatprep.mubr.msk.bf16.mxu0 %vm649_vm0, %v648_v0  ;;  %v550_v3 = vld [vmem:[#allocation2 + $0x10] sm:$0xff]   ;;  %v557_v4 = vld [vmem:[#allocation4] sm:$0xff]   ;;  %v551_v5 = vld [vmem:[#allocation2 + $0x18] sm:$0xff]  }
  0x37   :  { %501 = vmatprep.subr.bf16.mxu1 %v648_v0  ;;  %517 = vmatprep.mubr.msk.bf16.mxu1 %vm649_vm0, %v648_v0  ;;  %v558_v6 = vld [vmem:[#allocation4 + $0x8] sm:$0xff]   ;;  %v552_v7 = vld [vmem:[#allocation2 + $0x20] sm:$0xff]   ;;  %v559_v8 = vld [vmem:[#allocation4 + $0x10] sm:$0xff]  }
  0x38   :  { %482 = vmatpush3.bf16.msra.mxu0 %v548_v1  ;;  %502 = vmatpush3.bf16.msra.mxu1 %v557_v4  ;;  %v553_v9 = vld [vmem:[#allocation2 + $0x28] sm:$0xff]   ;;  %v560_v10 = vld [vmem:[#allocation4 + $0x18] sm:$0xff]   ;;  %v554_v11 = vld [vmem:[#allocation2 + $0x30] sm:$0xff]  }
  0x39   :  { %483 = vmatprep.subr.bf16.mxu0 %v648_v0  ;;  %503 = vmatprep.subr.bf16.mxu1 %v648_v0  ;;  %v561_v12 = vld [vmem:[#allocation4 + $0x20] sm:$0xff]   ;;  %v555_v13 = vld [vmem:[#allocation2 + $0x38] sm:$0xff]   ;;  %v562_v14 = vld [vmem:[#allocation4 + $0x28] sm:$0xff]  }
  0x3a   :  { %v556_v15 = vld [vmem:[%s796_s6] sm:$0xff]   ;;  %v563_v16 = vld [vmem:[#allocation4 + $0x30] sm:$0xff]   ;;  %v564_v17 = vld [vmem:[#allocation4 + $0x38] sm:$0xff]  }
  0x3b   :  { %v565_v18 = vld [vmem:[#allocation6] sm:$0xff]   ;;  %v566_v19 = vld [vmem:[#allocation6 + $0x8] sm:$0xff]   ;;  %v567_v20 = vld [vmem:[#allocation6 + $0x10] sm:$0xff]  }
  0x3c   :  { %484 = vmatpush3.bf16.msra.mxu0 %v549_v2  ;;  %504 = vmatpush3.bf16.msra.mxu1 %v558_v6  ;;  %v568_v21 = vld [vmem:[#allocation6 + $0x18] sm:$0xff]   ;;  %v569_v22 = vld [vmem:[#allocation6 + $0x20] sm:$0xff]   ;;  %v570_v23 = vld [vmem:[#allocation6 + $0x28] sm:$0xff]  }
  0x3d   :  { %485 = vmatprep.subr.bf16.mxu0 %v648_v0  ;;  %505 = vmatprep.subr.bf16.mxu1 %v648_v0  ;;  %v426_v24 = vld [vmem:[%s791_s1] ss:$0 sm:$0xff]  ;;  %v571_v34 = vld [vmem:[#allocation6 + $0x30] sm:$0xff]   ;;  %v572_v35 = vld [vmem:[#allocation6 + $0x38] sm:$0xff]  }
  0x3e   :  { %v436_v36 = vld [vmem:[%s793_s3] ss:$0 sm:$0xff] }
  0x3f   :  { %v445_v46 = vld [vmem:[%s795_s5] ss:$0 sm:$0xff] }
  0x40   :  { %486 = vmatpush3.bf16.msra.mxu0 %v550_v3  ;;  %506 = vmatpush3.bf16.msra.mxu1 %v559_v8 }
  0x41   :  { %487 = vmatprep.subr.bf16.mxu0 %v648_v0  ;;  %507 = vmatprep.subr.bf16.mxu1 %v648_v0 }
  0x44   :  { %488 = vmatpush3.bf16.msra.mxu0 %v551_v5  ;;  %508 = vmatpush3.bf16.msra.mxu1 %v560_v10 }
  0x45   :  { %489 = vmatprep.subr.bf16.mxu0 %v648_v0  ;;  %509 = vmatprep.subr.bf16.mxu1 %v648_v0 }
  0x48   :  { %490 = vmatpush3.bf16.msra.mxu0 %v552_v7  ;;  %510 = vmatpush3.bf16.msra.mxu1 %v561_v12 }
  0x49   :  { %491 = vmatprep.subr.bf16.mxu0 %v648_v0  ;;  %511 = vmatprep.subr.bf16.mxu1 %v648_v0 }
  0x4c   :  { %492 = vmatpush3.bf16.msra.mxu0 %v553_v9  ;;  %512 = vmatpush3.bf16.msra.mxu1 %v562_v14 }
  0x4d   :  { %493 = vmatprep.subr.bf16.mxu0 %v648_v0  ;;  %513 = vmatprep.subr.bf16.mxu1 %v648_v0 }
  0x50   :  { %494 = vmatpush3.bf16.msra.mxu0 %v554_v11  ;;  %514 = vmatpush3.bf16.msra.mxu1 %v563_v16 }
  0x51   :  { %495 = vmatprep.subr.bf16.mxu0 %v648_v0  ;;  %515 = vmatprep.subr.bf16.mxu1 %v648_v0 }
  0x54   :  { %496 = vmatpush3.bf16.msra.mxu0 %v555_v13  ;;  %516 = vmatpush3.bf16.msra.mxu1 %v564_v17 }
  0x55   :  { %521 = vmatprep.subr.bf16.mxu0 %v648_v0 }
  0x57   :  { %498 = vmatmul.mubr.bf16.vlgmr.msra.gmra.mrb[0].mxu0 %v556_v15 }
  0x58   :  { %537 = vmatprep.mubr.msk.bf16.mxu0 %vm649_vm0, %v648_v0  ;;  %522 = vmatpush3.bf16.msra.mxu0 %v565_v18 }
  0x59   :  { %523 = vmatprep.subr.bf16.mxu0 %v648_v0 }
  0x5c   :  { %524 = vmatpush3.bf16.msra.mxu0 %v566_v19 }
  0x5d   :  { %525 = vmatprep.subr.bf16.mxu0 %v648_v0 }
  0x60   :  { %526 = vmatpush3.bf16.msra.mxu0 %v567_v20 }
  0x61   :  { %527 = vmatprep.subr.bf16.mxu0 %v648_v0 }
  0x64   :  { %528 = vmatpush3.bf16.msra.mxu0 %v568_v21 }
  0x65   :  { %529 = vmatprep.subr.bf16.mxu0 %v648_v0 }
  0x68   :  { %530 = vmatpush3.bf16.msra.mxu0 %v569_v22 }
  0x69   :  { %531 = vmatprep.subr.bf16.mxu0 %v648_v0 }
  0x6c   :  { %532 = vmatpush3.bf16.msra.mxu0 %v570_v23 }
  0x6d   :  { %533 = vmatprep.subr.bf16.mxu0 %v648_v0 }
  0x70   :  { %534 = vmatpush3.bf16.msra.mxu0 %v571_v34 }
  0x71   :  { %535 = vmatprep.subr.bf16.mxu0 %v648_v0 }
  0x74   :  { %536 = vmatpush3.bf16.msra.mxu0 %v572_v35 }
 0x12a   :  { %v181_v25 = vpop.f32.mrb[0].mxu0 }
 0x12b   :  { %v182_v26 = vadd.f32 %v426_v24, %v181_v25  ;;  %v499_v27 = vpop.f32.mrb[1].mxu0 }
 0x12c   :  { %v184_v28 = vpop.f32.mrb[2].mxu0 }
 0x12d   :  { %v185_v29 = vadd.f32 %v426_v24, %v184_v28  ;;  %v500_v30 = vpop.f32.mrb[3].mxu0  ;;  %v188_v31 = vmax.f32 %v182_v26, 0.0 }
 0x12f   :  { %v189_v32 = vmax.f32 %v185_v29, 0.0 }
 0x131   :  { %v190_v33 = vpack.c.bf16 %v189_v32, %v188_v31 }
 0x133   :  { %518 = vmatmul.mubr.bf16.vlgmr.msra.gmra.mrb[0].mxu1 %v190_v33 }
 0x206   :  { %v296_v37 = vpop.f32.mrb[0].mxu1 }
 0x207   :  { %v297_v38 = vadd.f32 %v436_v36, %v296_v37  ;;  %v519_v39 = vpop.f32.mrb[1].mxu1 }
 0x208   :  { %v299_v40 = vpop.f32.mrb[2].mxu1 }
 0x209   :  { %v300_v41 = vadd.f32 %v436_v36, %v299_v40  ;;  %v520_v42 = vpop.f32.mrb[3].mxu1  ;;  %v303_v43 = vmax.f32 %v297_v38, 0.0 }
 0x20b   :  { %v304_v44 = vmax.f32 %v300_v41, 0.0 }
 0x20d   :  { %v305_v45 = vpack.c.bf16 %v304_v44, %v303_v43 }
 0x20f   :  { %538 = vmatmul.mubr.bf16.vlgmr.msra.gmra.mrb[4].mxu0 %v305_v45 }
 0x2e2   :  { %v411_v47 = vpop.f32.mrb[4].mxu0 }
 0x2e3   :  { %v412_v48 = vadd.f32 %v445_v46, %v411_v47  ;;  %v539_v49 = vpop.f32.mrb[5].mxu0 }
 0x2e4   :  { %v414_v50 = vpop.f32.mrb[6].mxu0 }
 0x2e5   :  { %418 = vst [vmem:[%s797_s7] sm:$0xff] %v412_v48  ;;  %v415_v51 = vadd.f32 %v445_v46, %v414_v50  ;;  %v540_v52 = vpop.f32.mrb[7].mxu0 }
 0x2e7   :  { %419 = vst [vmem:[%s797_s7 + $0x8] sm:$0xff] %v415_v51 }
 0x2e8   :  { %424 = vsyncpa [#allocation3], 1 }
 0x2e9   :  { %425 = vsyncpa [#allocation5], 1 }

</bundles_post_ra>
